<compile_context>
chip_gen: v7x
topology: tpu7x:2x2x1
jax: 0.10.0
libtpu: 0.0.40
codegen_flags: <defaults>
</compile_context>

<pallas_src>
import functools

import jax
import jax.numpy as jnp
import numpy as np
from jax import lax
from jax.experimental import pallas as pl
from jax.experimental.pallas import tpu as pltpu

INPUT = 28
HIDDEN = 64
NCLASS = 10
OUT_PAD = 128                        # lane-dense classifier width
_PRE_CHUNK_BYTES = 2 * 1024 * 1024   # per-buffer budget for the pre-gates block


def lstm_recurrence_kernel(pre_ref, whh_ref, wout_ref, bout_ref, out_ref,
                           h_ref, c_ref):
    """Serial LSTM recurrence over one (batch block, time chunk).

    pre_ref  : (Tc, Bb, 4H) f32   pre-computed x @ W_ih^T + (b_ih + b_hh)
    whh_ref  : (H, 4H)      bf16  W_hh^T
    wout_ref : (H, OUT_PAD) bf16  W_out^T zero-padded to 128 lanes
    bout_ref : (1, OUT_PAD) f32   b_out zero-padded
    out_ref  : (Bb, OUT_PAD) f32  logits tile (written on last time chunk)
    h_ref, c_ref : (Bb, H) f32 scratch, carried across time chunks
    """
    t_chunk = pl.program_id(1)
    H = h_ref.shape[-1]
    Tc = pre_ref.shape[0]

    @pl.when(t_chunk == 0)
    def _():
        h_ref[...] = jnp.zeros_like(h_ref)
        c_ref[...] = jnp.zeros_like(c_ref)

    whh = whh_ref[...]  # hoist weight load out of the time loop

    def step(t, carry):
        h, c = carry
        gates = pre_ref[t] + jnp.dot(h.astype(jnp.bfloat16), whh,
                                     preferred_element_type=jnp.float32)
        # Whole-tile activations (EUP), then lane slices.
        sig = jax.nn.sigmoid(gates)
        tah = jnp.tanh(gates)
        i_g = sig[:, 0 * H:1 * H]
        f_g = sig[:, 1 * H:2 * H]
        g_g = tah[:, 2 * H:3 * H]
        o_g = sig[:, 3 * H:4 * H]
        c = f_g * c + i_g * g_g          # f32 cell update
        h = o_g * jnp.tanh(c)
        return (h, c)

    unroll = Tc if Tc <= 16 else 8
    h, c = lax.fori_loop(0, Tc, step, (h_ref[...], c_ref[...]), unroll=unroll)
    h_ref[...] = h
    c_ref[...] = c

    @pl.when(t_chunk == pl.num_programs(1) - 1)
    def _():
        out_ref[...] = (jnp.dot(h.astype(jnp.bfloat16), wout_ref[...],
                                preferred_element_type=jnp.float32)
                        + bout_ref[...])


def _largest_divisor_leq(n, cap):
    cap = max(1, min(n, cap))
    for d in range(cap, 0, -1):
        if n % d == 0:
            return d
    return 1


@functools.partial(jax.jit, static_argnames=("batch_block", "time_chunk"))
def rnn_forward(x_bsi, params, *, batch_block=None, time_chunk=None):
    """x_bsi: (batch, seq, INPUT) float32 -> (batch, NCLASS) float32 logits."""
    wih_bf, whh_bf, bias, wout_pad_bf, bout_pad = params
    B, T, I = x_bsi.shape
    H = HIDDEN
    assert I == INPUT

    # ---- hoisted input projection: one big batched matmul, off the serial path.
    x_tbi = jnp.transpose(x_bsi, (1, 0, 2))                       # (T, B, I)
    pre = jnp.dot(x_tbi.reshape(T * B, I).astype(jnp.bfloat16), wih_bf,
                  preferred_element_type=jnp.float32)
    pre = pre.reshape(T, B, 4 * H) + bias                         # (T, B, 4H) f32

    # ---- tile selection ------------------------------------------------------
    if batch_block is None:
        # Give v7x's two TensorCores independent batch halves when batch allows;
        # degenerates to a single batch block (no-op) otherwise.
        batch_block = B // 2 if (B % 16 == 0) else B
    Bb = batch_block
    assert B % Bb == 0 and (Bb == B or Bb % 8 == 0)

    if time_chunk is None:
        cap = max(1, _PRE_CHUNK_BYTES // (Bb * 4 * H * 4))
        time_chunk = _largest_divisor_leq(T, min(cap, 128))
    Tc = time_chunk
    assert T % Tc == 0

    grid = (B // Bb, T // Tc)
    const = lambda b, t: (0, 0)

    out_padded = pl.pallas_call(
        lstm_recurrence_kernel,
        out_shape=jax.ShapeDtypeStruct((B, OUT_PAD), jnp.float32),
        grid_spec=pltpu.PrefetchScalarGridSpec(
            num_scalar_prefetch=0,
            grid=grid,
            in_specs=[
                pl.BlockSpec((Tc, Bb, 4 * H), lambda b, t: (t, b, 0)),
                pl.BlockSpec((H, 4 * H), const),
                pl.BlockSpec((H, OUT_PAD), const),
                pl.BlockSpec((1, OUT_PAD), const),
            ],
            out_specs=pl.BlockSpec((Bb, OUT_PAD), lambda b, t: (b, 0)),
            scratch_shapes=[
                pltpu.VMEM((Bb, H), jnp.float32),   # h carry
                pltpu.VMEM((Bb, H), jnp.float32),   # c carry
            ],
        ),
        compiler_params=pltpu.CompilerParams(
            dimension_semantics=("parallel", "arbitrary"),
            vmem_limit_bytes=32 * 1024 * 1024,
        ),
    )(pre, whh_bf, wout_pad_bf, bout_pad)

    return out_padded[:, :NCLASS]


def init_params(key):
    """Deterministic init; shapes match torch.nn.LSTM(28, 64) + Linear(64, 10)."""
    k = 1.0 / np.sqrt(HIDDEN)
    keys = jax.random.split(key, 6)
    return dict(
        w_ih=jax.random.uniform(keys[0], (4 * HIDDEN, INPUT), jnp.float32, -k, k),
        w_hh=jax.random.uniform(keys[1], (4 * HIDDEN, HIDDEN), jnp.float32, -k, k),
        b_ih=jax.random.uniform(keys[2], (4 * HIDDEN,), jnp.float32, -k, k),
        b_hh=jax.random.uniform(keys[3], (4 * HIDDEN,), jnp.float32, -k, k),
        w_out=jax.random.uniform(keys[4], (NCLASS, HIDDEN), jnp.float32, -k, k),
        b_out=jax.random.uniform(keys[5], (NCLASS,), jnp.float32, -k, k),
    )


def prepare_params(raw):
    """Kernel-ready params: transposed, fused bias, bf16 matmul operands,
    lane-padded (128-wide) classifier head."""
    wih_bf = raw["w_ih"].T.astype(jnp.bfloat16)                  # (INPUT, 4H)
    whh_bf = raw["w_hh"].T.astype(jnp.bfloat16)                  # (H, 4H)
    bias = (raw["b_ih"] + raw["b_hh"])[None, :]                  # (1, 4H) f32
    wout_pad = jnp.zeros((HIDDEN, OUT_PAD), jnp.float32)
    wout_pad = wout_pad.at[:, :NCLASS].set(raw["w_out"].T)
    bout_pad = jnp.zeros((1, OUT_PAD), jnp.float32)
    bout_pad = bout_pad.at[0, :NCLASS].set(raw["b_out"])
    return (wih_bf, whh_bf, bias, wout_pad.astype(jnp.bfloat16), bout_pad)


def rnn_forward_ref(x_bsi, raw):
    """Pure-JAX f32 reference (lax.scan LSTM) for correctness checking."""
    B = x_bsi.shape[0]
    H = HIDDEN
    w_ih, w_hh = raw["w_ih"], raw["w_hh"]
    bias = raw["b_ih"] + raw["b_hh"]

    def step(carry, x_t):
        h, c = carry
        gates = x_t @ w_ih.T + h @ w_hh.T + bias
        i = jax.nn.sigmoid(gates[:, 0 * H:1 * H])
        f = jax.nn.sigmoid(gates[:, 1 * H:2 * H])
        g = jnp.tanh(gates[:, 2 * H:3 * H])
        o = jax.nn.sigmoid(gates[:, 3 * H:4 * H])
        c = f * c + i * g
        h = o * jnp.tanh(c)
        return (h, c), None

    h0 = jnp.zeros((B, H), jnp.float32)
    (h_T, _), _ = lax.scan(step, (h0, h0), jnp.transpose(x_bsi, (1, 0, 2)))
    return h_T @ raw["w_out"].T + raw["b_out"]


if __name__ == "__main__":
    key = jax.random.PRNGKey(0)
    kx, kp = jax.random.split(key)

    B, T = 2, 8
    x = jax.random.normal(kx, (B, T, INPUT), jnp.float32)   # (batch, seq, 28)
    raw = init_params(kp)
    params = prepare_params(raw)

    out = jax.block_until_ready(rnn_forward(x, params))
    ref = jax.block_until_ready(rnn_forward_ref(x, raw))

    assert out.shape == (B, NCLASS)
    # bf16 matmul operands (f32 accumulate) -> tolerance relaxed vs pure-f32 ref.
    np.testing.assert_allclose(np.asarray(out), np.asarray(ref),
                               rtol=2e-2, atol=2e-2)
    print("KERNEL_OK")
</pallas_src>

<mosaic_0001>
module attributes {stable_mosaic.version = 11 : i64} {
  func.func @lstm_recurrence_kernel(%arg0: i32, %arg1: i32, %arg2: memref<8x2x256xf32, #tpu.memory_space<vmem>>, %arg3: memref<64x256xbf16, #tpu.memory_space<vmem>>, %arg4: memref<64x128xbf16, #tpu.memory_space<vmem>>, %arg5: memref<1x128xf32, #tpu.memory_space<vmem>>, %arg6: memref<2x128xf32, #tpu.memory_space<vmem>>, %arg7: memref<2x64xf32, #tpu.memory_space<vmem>>, %arg8: memref<2x64xf32, #tpu.memory_space<vmem>>) attributes {dimension_semantics = [#tpu.dimension_semantics<parallel>, #tpu.dimension_semantics<arbitrary>], iteration_bounds = array<i64: 1, 1>, scalar_prefetch = 0 : i64, scratch_operands = 2 : i64, tpu.core_type = #tpu.core_type<tc>, window_params = [{transform_indices = @transform_0, window_bounds = array<i64: 8, 2, 256>}, {pipeline_mode = #tpu.pipeline_mode<synchronous>, transform_indices = @transform_1, window_bounds = array<i64: 64, 256>}, {pipeline_mode = #tpu.pipeline_mode<synchronous>, transform_indices = @transform_2, window_bounds = array<i64: 64, 128>}, {pipeline_mode = #tpu.pipeline_mode<synchronous>, transform_indices = @transform_3, window_bounds = array<i64: 1, 128>}, {transform_indices = @transform_4, window_bounds = array<i64: 2, 128>}]} {
    %c0_i32 = arith.constant 0 : i32
    %0 = arith.cmpi eq, %arg1, %c0_i32 : i32
    %1 = arith.extui %0 : i1 to i32
    %c0_i32_0 = arith.constant 0 : i32
    %2 = arith.cmpi ne, %1, %c0_i32_0 : i32
    scf.if %2 {
      %cst_44 = arith.constant 0.000000e+00 : f32
      %179 = vector.broadcast %cst_44 : f32 to vector<2x64xf32>
      %c0_45 = arith.constant 0 : index
      %c0_46 = arith.constant 0 : index
      %180 = vector.load %arg7[%c0_45, %c0_46] : memref<2x64xf32, #tpu.memory_space<vmem>>, vector<2x64xf32>
      tpu.vector_store %arg7[%c0_45, %c0_46], %179 {strides = array<i32>} : memref<2x64xf32, #tpu.memory_space<vmem>>, vector<2x64xf32>,
      %cst_47 = arith.constant 0.000000e+00 : f32
      %181 = vector.broadcast %cst_47 : f32 to vector<2x64xf32>
      %c0_48 = arith.constant 0 : index
      %c0_49 = arith.constant 0 : index
      %182 = vector.load %arg8[%c0_48, %c0_49] : memref<2x64xf32, #tpu.memory_space<vmem>>, vector<2x64xf32>
      tpu.vector_store %arg8[%c0_48, %c0_49], %181 {strides = array<i32>} : memref<2x64xf32, #tpu.memory_space<vmem>>, vector<2x64xf32>,
    } else {
    }
    %c0 = arith.constant 0 : index
    %c0_1 = arith.constant 0 : index
    %3 = vector.load %arg3[%c0, %c0_1] : memref<64x256xbf16, #tpu.memory_space<vmem>>, vector<64x256xbf16>
    %c0_2 = arith.constant 0 : index
    %c0_3 = arith.constant 0 : index
    %4 = vector.load %arg7[%c0_2, %c0_3] : memref<2x64xf32, #tpu.memory_space<vmem>>, vector<2x64xf32>
    %c0_4 = arith.constant 0 : index
    %c0_5 = arith.constant 0 : index
    %5 = vector.load %arg8[%c0_4, %c0_5] : memref<2x64xf32, #tpu.memory_space<vmem>>, vector<2x64xf32>
    %c0_i32_6 = arith.constant 0 : i32
    %6 = arith.index_cast %c0_i32_6 : i32 to index
    %c0_7 = arith.constant 0 : index
    %c0_8 = arith.constant 0 : index
    %7 = vector.load %arg2[%6, %c0_7, %c0_8] : memref<8x2x256xf32, #tpu.memory_space<vmem>>, vector<1x2x256xf32>
    %8 = vector.shape_cast %7 : vector<1x2x256xf32> to vector<2x256xf32>
    %9 = arith.truncf %4 : vector<2x64xf32> to vector<2x64xbf16>
    %cst = arith.constant dense<0.000000e+00> : vector<2x256xf32>
    %10 = tpu.matmul %9, %3, %cst {dimension_numbers = #tpu.dot_dimension_numbers<[1], [0], [0], [1], [0, 0, 1, 1], [], []>} : vector<2x64xbf16>, vector<64x256xbf16>, vector<2x256xf32> -> vector<2x256xf32>
    %11 = arith.addf %8, %10 : vector<2x256xf32>
    %12 = arith.negf %11 : vector<2x256xf32>
    %13 = math.exp %12 : vector<2x256xf32>
    %cst_9 = arith.constant 1.000000e+00 : f32
    %14 = vector.broadcast %cst_9 : f32 to vector<2x256xf32>
    %15 = arith.addf %14, %13 : vector<2x256xf32>
    %16 = arith.divf %14, %15 : vector<2x256xf32>
    %17 = math.tanh %11 : vector<2x256xf32>
    %18 = vector.extract_strided_slice %16 {offsets = [0, 0], sizes = [2, 64], strides = [1, 1]} : vector<2x256xf32> to vector<2x64xf32>
    %19 = vector.extract_strided_slice %16 {offsets = [0, 64], sizes = [2, 64], strides = [1, 1]} : vector<2x256xf32> to vector<2x64xf32>
    %20 = vector.extract_strided_slice %17 {offsets = [0, 128], sizes = [2, 64], strides = [1, 1]} : vector<2x256xf32> to vector<2x64xf32>
    %21 = vector.extract_strided_slice %16 {offsets = [0, 192], sizes = [2, 64], strides = [1, 1]} : vector<2x256xf32> to vector<2x64xf32>
    %22 = arith.mulf %19, %5 : vector<2x64xf32>
    %23 = arith.mulf %18, %20 : vector<2x64xf32>
    %24 = arith.addf %22, %23 : vector<2x64xf32>
    %25 = math.tanh %24 : vector<2x64xf32>
    %26 = arith.mulf %21, %25 : vector<2x64xf32>
    %c1_i32 = arith.constant 1 : i32
    %27 = arith.index_cast %c1_i32 : i32 to index
    %c0_10 = arith.constant 0 : index
    %c0_11 = arith.constant 0 : index
    %28 = vector.load %arg2[%27, %c0_10, %c0_11] : memref<8x2x256xf32, #tpu.memory_space<vmem>>, vector<1x2x256xf32>
    %29 = vector.shape_cast %28 : vector<1x2x256xf32> to vector<2x256xf32>
    %30 = arith.truncf %26 : vector<2x64xf32> to vector<2x64xbf16>
    %cst_12 = arith.constant dense<0.000000e+00> : vector<2x256xf32>
    %31 = tpu.matmul %30, %3, %cst_12 {dimension_numbers = #tpu.dot_dimension_numbers<[1], [0], [0], [1], [0, 0, 1, 1], [], []>} : vector<2x64xbf16>, vector<64x256xbf16>, vector<2x256xf32> -> vector<2x256xf32>
    %32 = arith.addf %29, %31 : vector<2x256xf32>
    %33 = arith.negf %32 : vector<2x256xf32>
    %34 = math.exp %33 : vector<2x256xf32>
    %cst_13 = arith.constant 1.000000e+00 : f32
    %35 = vector.broadcast %cst_13 : f32 to vector<2x256xf32>
    %36 = arith.addf %35, %34 : vector<2x256xf32>
    %37 = arith.divf %35, %36 : vector<2x256xf32>
    %38 = math.tanh %32 : vector<2x256xf32>
    %39 = vector.extract_strided_slice %37 {offsets = [0, 0], sizes = [2, 64], strides = [1, 1]} : vector<2x256xf32> to vector<2x64xf32>
    %40 = vector.extract_strided_slice %37 {offsets = [0, 64], sizes = [2, 64], strides = [1, 1]} : vector<2x256xf32> to vector<2x64xf32>
    %41 = vector.extract_strided_slice %38 {offsets = [0, 128], sizes = [2, 64], strides = [1, 1]} : vector<2x256xf32> to vector<2x64xf32>
    %42 = vector.extract_strided_slice %37 {offsets = [0, 192], sizes = [2, 64], strides = [1, 1]} : vector<2x256xf32> to vector<2x64xf32>
    %43 = arith.mulf %40, %24 : vector<2x64xf32>
    %44 = arith.mulf %39, %41 : vector<2x64xf32>
    %45 = arith.addf %43, %44 : vector<2x64xf32>
    %46 = math.tanh %45 : vector<2x64xf32>
    %47 = arith.mulf %42, %46 : vector<2x64xf32>
    %c2_i32 = arith.constant 2 : i32
    %48 = arith.index_cast %c2_i32 : i32 to index
    %c0_14 = arith.constant 0 : index
    %c0_15 = arith.constant 0 : index
    %49 = vector.load %arg2[%48, %c0_14, %c0_15] : memref<8x2x256xf32, #tpu.memory_space<vmem>>, vector<1x2x256xf32>
    %50 = vector.shape_cast %49 : vector<1x2x256xf32> to vector<2x256xf32>
    %51 = arith.truncf %47 : vector<2x64xf32> to vector<2x64xbf16>
    %cst_16 = arith.constant dense<0.000000e+00> : vector<2x256xf32>
    %52 = tpu.matmul %51, %3, %cst_16 {dimension_numbers = #tpu.dot_dimension_numbers<[1], [0], [0], [1], [0, 0, 1, 1], [], []>} : vector<2x64xbf16>, vector<64x256xbf16>, vector<2x256xf32> -> vector<2x256xf32>
    %53 = arith.addf %50, %52 : vector<2x256xf32>
    %54 = arith.negf %53 : vector<2x256xf32>
    %55 = math.exp %54 : vector<2x256xf32>
    %cst_17 = arith.constant 1.000000e+00 : f32
    %56 = vector.broadcast %cst_17 : f32 to vector<2x256xf32>
    %57 = arith.addf %56, %55 : vector<2x256xf32>
    %58 = arith.divf %56, %57 : vector<2x256xf32>
    %59 = math.tanh %53 : vector<2x256xf32>
    %60 = vector.extract_strided_slice %58 {offsets = [0, 0], sizes = [2, 64], strides = [1, 1]} : vector<2x256xf32> to vector<2x64xf32>
    %61 = vector.extract_strided_slice %58 {offsets = [0, 64], sizes = [2, 64], strides = [1, 1]} : vector<2x256xf32> to vector<2x64xf32>
    %62 = vector.extract_strided_slice %59 {offsets = [0, 128], sizes = [2, 64], strides = [1, 1]} : vector<2x256xf32> to vector<2x64xf32>
    %63 = vector.extract_strided_slice %58 {offsets = [0, 192], sizes = [2, 64], strides = [1, 1]} : vector<2x256xf32> to vector<2x64xf32>
    %64 = arith.mulf %61, %45 : vector<2x64xf32>
    %65 = arith.mulf %60, %62 : vector<2x64xf32>
    %66 = arith.addf %64, %65 : vector<2x64xf32>
    %67 = math.tanh %66 : vector<2x64xf32>
    %68 = arith.mulf %63, %67 : vector<2x64xf32>
    %c3_i32 = arith.constant 3 : i32
    %69 = arith.index_cast %c3_i32 : i32 to index
    %c0_18 = arith.constant 0 : index
    %c0_19 = arith.constant 0 : index
    %70 = vector.load %arg2[%69, %c0_18, %c0_19] : memref<8x2x256xf32, #tpu.memory_space<vmem>>, vector<1x2x256xf32>
    %71 = vector.shape_cast %70 : vector<1x2x256xf32> to vector<2x256xf32>
    %72 = arith.truncf %68 : vector<2x64xf32> to vector<2x64xbf16>
    %cst_20 = arith.constant dense<0.000000e+00> : vector<2x256xf32>
    %73 = tpu.matmul %72, %3, %cst_20 {dimension_numbers = #tpu.dot_dimension_numbers<[1], [0], [0], [1], [0, 0, 1, 1], [], []>} : vector<2x64xbf16>, vector<64x256xbf16>, vector<2x256xf32> -> vector<2x256xf32>
    %74 = arith.addf %71, %73 : vector<2x256xf32>
    %75 = arith.negf %74 : vector<2x256xf32>
    %76 = math.exp %75 : vector<2x256xf32>
    %cst_21 = arith.constant 1.000000e+00 : f32
    %77 = vector.broadcast %cst_21 : f32 to vector<2x256xf32>
    %78 = arith.addf %77, %76 : vector<2x256xf32>
    %79 = arith.divf %77, %78 : vector<2x256xf32>
    %80 = math.tanh %74 : vector<2x256xf32>
    %81 = vector.extract_strided_slice %79 {offsets = [0, 0], sizes = [2, 64], strides = [1, 1]} : vector<2x256xf32> to vector<2x64xf32>
    %82 = vector.extract_strided_slice %79 {offsets = [0, 64], sizes = [2, 64], strides = [1, 1]} : vector<2x256xf32> to vector<2x64xf32>
    %83 = vector.extract_strided_slice %80 {offsets = [0, 128], sizes = [2, 64], strides = [1, 1]} : vector<2x256xf32> to vector<2x64xf32>
    %84 = vector.extract_strided_slice %79 {offsets = [0, 192], sizes = [2, 64], strides = [1, 1]} : vector<2x256xf32> to vector<2x64xf32>
    %85 = arith.mulf %82, %66 : vector<2x64xf32>
    %86 = arith.mulf %81, %83 : vector<2x64xf32>
    %87 = arith.addf %85, %86 : vector<2x64xf32>
    %88 = math.tanh %87 : vector<2x64xf32>
    %89 = arith.mulf %84, %88 : vector<2x64xf32>
    %c4_i32 = arith.constant 4 : i32
    %90 = arith.index_cast %c4_i32 : i32 to index
    %c0_22 = arith.constant 0 : index
    %c0_23 = arith.constant 0 : index
    %91 = vector.load %arg2[%90, %c0_22, %c0_23] : memref<8x2x256xf32, #tpu.memory_space<vmem>>, vector<1x2x256xf32>
    %92 = vector.shape_cast %91 : vector<1x2x256xf32> to vector<2x256xf32>
    %93 = arith.truncf %89 : vector<2x64xf32> to vector<2x64xbf16>
    %cst_24 = arith.constant dense<0.000000e+00> : vector<2x256xf32>
    %94 = tpu.matmul %93, %3, %cst_24 {dimension_numbers = #tpu.dot_dimension_numbers<[1], [0], [0], [1], [0, 0, 1, 1], [], []>} : vector<2x64xbf16>, vector<64x256xbf16>, vector<2x256xf32> -> vector<2x256xf32>
    %95 = arith.addf %92, %94 : vector<2x256xf32>
    %96 = arith.negf %95 : vector<2x256xf32>
    %97 = math.exp %96 : vector<2x256xf32>
    %cst_25 = arith.constant 1.000000e+00 : f32
    %98 = vector.broadcast %cst_25 : f32 to vector<2x256xf32>
    %99 = arith.addf %98, %97 : vector<2x256xf32>
    %100 = arith.divf %98, %99 : vector<2x256xf32>
    %101 = math.tanh %95 : vector<2x256xf32>
    %102 = vector.extract_strided_slice %100 {offsets = [0, 0], sizes = [2, 64], strides = [1, 1]} : vector<2x256xf32> to vector<2x64xf32>
    %103 = vector.extract_strided_slice %100 {offsets = [0, 64], sizes = [2, 64], strides = [1, 1]} : vector<2x256xf32> to vector<2x64xf32>
    %104 = vector.extract_strided_slice %101 {offsets = [0, 128], sizes = [2, 64], strides = [1, 1]} : vector<2x256xf32> to vector<2x64xf32>
    %105 = vector.extract_strided_slice %100 {offsets = [0, 192], sizes = [2, 64], strides = [1, 1]} : vector<2x256xf32> to vector<2x64xf32>
    %106 = arith.mulf %103, %87 : vector<2x64xf32>
    %107 = arith.mulf %102, %104 : vector<2x64xf32>
    %108 = arith.addf %106, %107 : vector<2x64xf32>
    %109 = math.tanh %108 : vector<2x64xf32>
    %110 = arith.mulf %105, %109 : vector<2x64xf32>
    %c5_i32 = arith.constant 5 : i32
    %111 = arith.index_cast %c5_i32 : i32 to index
    %c0_26 = arith.constant 0 : index
    %c0_27 = arith.constant 0 : index
    %112 = vector.load %arg2[%111, %c0_26, %c0_27] : memref<8x2x256xf32, #tpu.memory_space<vmem>>, vector<1x2x256xf32>
    %113 = vector.shape_cast %112 : vector<1x2x256xf32> to vector<2x256xf32>
    %114 = arith.truncf %110 : vector<2x64xf32> to vector<2x64xbf16>
    %cst_28 = arith.constant dense<0.000000e+00> : vector<2x256xf32>
    %115 = tpu.matmul %114, %3, %cst_28 {dimension_numbers = #tpu.dot_dimension_numbers<[1], [0], [0], [1], [0, 0, 1, 1], [], []>} : vector<2x64xbf16>, vector<64x256xbf16>, vector<2x256xf32> -> vector<2x256xf32>
    %116 = arith.addf %113, %115 : vector<2x256xf32>
    %117 = arith.negf %116 : vector<2x256xf32>
    %118 = math.exp %117 : vector<2x256xf32>
    %cst_29 = arith.constant 1.000000e+00 : f32
    %119 = vector.broadcast %cst_29 : f32 to vector<2x256xf32>
    %120 = arith.addf %119, %118 : vector<2x256xf32>
    %121 = arith.divf %119, %120 : vector<2x256xf32>
    %122 = math.tanh %116 : vector<2x256xf32>
    %123 = vector.extract_strided_slice %121 {offsets = [0, 0], sizes = [2, 64], strides = [1, 1]} : vector<2x256xf32> to vector<2x64xf32>
    %124 = vector.extract_strided_slice %121 {offsets = [0, 64], sizes = [2, 64], strides = [1, 1]} : vector<2x256xf32> to vector<2x64xf32>
    %125 = vector.extract_strided_slice %122 {offsets = [0, 128], sizes = [2, 64], strides = [1, 1]} : vector<2x256xf32> to vector<2x64xf32>
    %126 = vector.extract_strided_slice %121 {offsets = [0, 192], sizes = [2, 64], strides = [1, 1]} : vector<2x256xf32> to vector<2x64xf32>
    %127 = arith.mulf %124, %108 : vector<2x64xf32>
    %128 = arith.mulf %123, %125 : vector<2x64xf32>
    %129 = arith.addf %127, %128 : vector<2x64xf32>
    %130 = math.tanh %129 : vector<2x64xf32>
    %131 = arith.mulf %126, %130 : vector<2x64xf32>
    %c6_i32 = arith.constant 6 : i32
    %132 = arith.index_cast %c6_i32 : i32 to index
    %c0_30 = arith.constant 0 : index
    %c0_31 = arith.constant 0 : index
    %133 = vector.load %arg2[%132, %c0_30, %c0_31] : memref<8x2x256xf32, #tpu.memory_space<vmem>>, vector<1x2x256xf32>
    %134 = vector.shape_cast %133 : vector<1x2x256xf32> to vector<2x256xf32>
    %135 = arith.truncf %131 : vector<2x64xf32> to vector<2x64xbf16>
    %cst_32 = arith.constant dense<0.000000e+00> : vector<2x256xf32>
    %136 = tpu.matmul %135, %3, %cst_32 {dimension_numbers = #tpu.dot_dimension_numbers<[1], [0], [0], [1], [0, 0, 1, 1], [], []>} : vector<2x64xbf16>, vector<64x256xbf16>, vector<2x256xf32> -> vector<2x256xf32>
    %137 = arith.addf %134, %136 : vector<2x256xf32>
    %138 = arith.negf %137 : vector<2x256xf32>
    %139 = math.exp %138 : vector<2x256xf32>
    %cst_33 = arith.constant 1.000000e+00 : f32
    %140 = vector.broadcast %cst_33 : f32 to vector<2x256xf32>
    %141 = arith.addf %140, %139 : vector<2x256xf32>
    %142 = arith.divf %140, %141 : vector<2x256xf32>
    %143 = math.tanh %137 : vector<2x256xf32>
    %144 = vector.extract_strided_slice %142 {offsets = [0, 0], sizes = [2, 64], strides = [1, 1]} : vector<2x256xf32> to vector<2x64xf32>
    %145 = vector.extract_strided_slice %142 {offsets = [0, 64], sizes = [2, 64], strides = [1, 1]} : vector<2x256xf32> to vector<2x64xf32>
    %146 = vector.extract_strided_slice %143 {offsets = [0, 128], sizes = [2, 64], strides = [1, 1]} : vector<2x256xf32> to vector<2x64xf32>
    %147 = vector.extract_strided_slice %142 {offsets = [0, 192], sizes = [2, 64], strides = [1, 1]} : vector<2x256xf32> to vector<2x64xf32>
    %148 = arith.mulf %145, %129 : vector<2x64xf32>
    %149 = arith.mulf %144, %146 : vector<2x64xf32>
    %150 = arith.addf %148, %149 : vector<2x64xf32>
    %151 = math.tanh %150 : vector<2x64xf32>
    %152 = arith.mulf %147, %151 : vector<2x64xf32>
    %c7_i32 = arith.constant 7 : i32
    %153 = arith.index_cast %c7_i32 : i32 to index
    %c0_34 = arith.constant 0 : index
    %c0_35 = arith.constant 0 : index
    %154 = vector.load %arg2[%153, %c0_34, %c0_35] : memref<8x2x256xf32, #tpu.memory_space<vmem>>, vector<1x2x256xf32>
    %155 = vector.shape_cast %154 : vector<1x2x256xf32> to vector<2x256xf32>
    %156 = arith.truncf %152 : vector<2x64xf32> to vector<2x64xbf16>
    %cst_36 = arith.constant dense<0.000000e+00> : vector<2x256xf32>
    %157 = tpu.matmul %156, %3, %cst_36 {dimension_numbers = #tpu.dot_dimension_numbers<[1], [0], [0], [1], [0, 0, 1, 1], [], []>} : vector<2x64xbf16>, vector<64x256xbf16>, vector<2x256xf32> -> vector<2x256xf32>
    %158 = arith.addf %155, %157 : vector<2x256xf32>
    %159 = arith.negf %158 : vector<2x256xf32>
    %160 = math.exp %159 : vector<2x256xf32>
    %cst_37 = arith.constant 1.000000e+00 : f32
    %161 = vector.broadcast %cst_37 : f32 to vector<2x256xf32>
    %162 = arith.addf %161, %160 : vector<2x256xf32>
    %163 = arith.divf %161, %162 : vector<2x256xf32>
    %164 = math.tanh %158 : vector<2x256xf32>
    %165 = vector.extract_strided_slice %163 {offsets = [0, 0], sizes = [2, 64], strides = [1, 1]} : vector<2x256xf32> to vector<2x64xf32>
    %166 = vector.extract_strided_slice %163 {offsets = [0, 64], sizes = [2, 64], strides = [1, 1]} : vector<2x256xf32> to vector<2x64xf32>
    %167 = vector.extract_strided_slice %164 {offsets = [0, 128], sizes = [2, 64], strides = [1, 1]} : vector<2x256xf32> to vector<2x64xf32>
    %168 = vector.extract_strided_slice %163 {offsets = [0, 192], sizes = [2, 64], strides = [1, 1]} : vector<2x256xf32> to vector<2x64xf32>
    %169 = arith.mulf %166, %150 : vector<2x64xf32>
    %170 = arith.mulf %165, %167 : vector<2x64xf32>
    %171 = arith.addf %169, %170 : vector<2x64xf32>
    %172 = math.tanh %171 : vector<2x64xf32>
    %173 = arith.mulf %168, %172 : vector<2x64xf32>
    %c8_i32 = arith.constant 8 : i32
    %c0_38 = arith.constant 0 : index
    %c0_39 = arith.constant 0 : index
    %174 = vector.load %arg7[%c0_38, %c0_39] : memref<2x64xf32, #tpu.memory_space<vmem>>, vector<2x64xf32>
    tpu.vector_store %arg7[%c0_38, %c0_39], %173 {strides = array<i32>} : memref<2x64xf32, #tpu.memory_space<vmem>>, vector<2x64xf32>,
    %c0_40 = arith.constant 0 : index
    %c0_41 = arith.constant 0 : index
    %175 = vector.load %arg8[%c0_40, %c0_41] : memref<2x64xf32, #tpu.memory_space<vmem>>, vector<2x64xf32>
    tpu.vector_store %arg8[%c0_40, %c0_41], %171 {strides = array<i32>} : memref<2x64xf32, #tpu.memory_space<vmem>>, vector<2x64xf32>,
    %c0_i32_42 = arith.constant 0 : i32
    %176 = arith.cmpi eq, %arg1, %c0_i32_42 : i32
    %177 = arith.extui %176 : i1 to i32
    %c0_i32_43 = arith.constant 0 : i32
    %178 = arith.cmpi ne, %177, %c0_i32_43 : i32
    scf.if %178 {
      %179 = arith.truncf %173 : vector<2x64xf32> to vector<2x64xbf16>
      %c0_44 = arith.constant 0 : index
      %c0_45 = arith.constant 0 : index
      %180 = vector.load %arg4[%c0_44, %c0_45] : memref<64x128xbf16, #tpu.memory_space<vmem>>, vector<64x128xbf16>
      %cst_46 = arith.constant dense<0.000000e+00> : vector<2x128xf32>
      %181 = tpu.matmul %179, %180, %cst_46 {dimension_numbers = #tpu.dot_dimension_numbers<[1], [0], [0], [1], [0, 0, 1, 1], [], []>} : vector<2x64xbf16>, vector<64x128xbf16>, vector<2x128xf32> -> vector<2x128xf32>
      %c0_47 = arith.constant 0 : index
      %c0_48 = arith.constant 0 : index
      %182 = vector.load %arg5[%c0_47, %c0_48] : memref<1x128xf32, #tpu.memory_space<vmem>>, vector<1x128xf32>
      %183 = vector.broadcast %182 : vector<1x128xf32> to vector<2x128xf32>
      %184 = arith.addf %181, %183 : vector<2x128xf32>
      %c0_49 = arith.constant 0 : index
      %c0_50 = arith.constant 0 : index
      %185 = vector.load %arg6[%c0_49, %c0_50] : memref<2x128xf32, #tpu.memory_space<vmem>>, vector<2x128xf32>
      tpu.vector_store %arg6[%c0_49, %c0_50], %184 {strides = array<i32>} : memref<2x128xf32, #tpu.memory_space<vmem>>, vector<2x128xf32>,
    } else {
    }
    return
  }
  func.func @transform_0(%arg0: i32, %arg1: i32) -> (i32, i32, i32) {
    %c0_i32 = arith.constant 0 : i32
    %c0_i32_0 = arith.constant 0 : i32
    return %arg1, %arg0, %c0_i32 : i32, i32, i32
  }
  func.func @transform_1(%arg0: i32, %arg1: i32) -> (i32, i32) {
    %c0_i32 = arith.constant 0 : i32
    %c0_i32_0 = arith.constant 0 : i32
    %c0_i32_1 = arith.constant 0 : i32
    return %c0_i32, %c0_i32_0 : i32, i32
  }
  func.func @transform_2(%arg0: i32, %arg1: i32) -> (i32, i32) {
    %c0_i32 = arith.constant 0 : i32
    %c0_i32_0 = arith.constant 0 : i32
    %c0_i32_1 = arith.constant 0 : i32
    return %c0_i32, %c0_i32_0 : i32, i32
  }
  func.func @transform_3(%arg0: i32, %arg1: i32) -> (i32, i32) {
    %c0_i32 = arith.constant 0 : i32
    %c0_i32_0 = arith.constant 0 : i32
    %c0_i32_1 = arith.constant 0 : i32
    return %c0_i32, %c0_i32_0 : i32, i32
  }
  func.func @transform_4(%arg0: i32, %arg1: i32) -> (i32, i32) {
    %c0_i32 = arith.constant 0 : i32
    %c0_i32_0 = arith.constant 0 : i32
    return %arg0, %c0_i32 : i32, i32
  }
}

</mosaic_0001>

<bundles_post_ra>
// kernel: rnn_forward.1
= control target key start
LH: loop header
LB: loop body
LE: loop exit
PB: predicated region body
PF: predicated region fallthrough
CT: control target
= control target key end

     0   :  { %vm23_vm0 = vcmask 517120   ;;  %v1063_v2 = vmov 0   ;;  %v1064_v4 = vmov 0.0   ;;  %s1314_s0 = inlined_call_operand.vmem [shape: f32[8,2,256], index: 0, kind: input, shape index: {}]   ;;  %s1315_s1 = inlined_call_operand.vmem [shape: bf16[64,256], index: 1, kind: input, shape index: {}]   ;;  %s1316_s2 = inlined_call_operand.vmem [shape: bf16[64,128], index: 2, kind: input, shape index: {}]   ;;  %s1317_s3 = inlined_call_operand.vmem [shape: f32[1,128], index: 3, kind: input, shape index: {}]   ;;  %s1318_s4 = inlined_call_operand.hbm [shape: f32[2,128], index: 4, kind: output, shape index: {}]  }
   0x1   :  { %v1097_v0 = vld [vmem:[%s1315_s1 + $0x4] ss:$8 sps:$4 sm:$0xff]   ;;  %v1102_v1 = vld [vmem:[%s1315_s1] ss:$8 sps:$4 sm:$0xff]   ;;  %114 = vmatprep.mubr.bf16.mxu0 %v1063_v2  ;;  %212 = vmatprep.mubr.bf16.mxu1 %v1063_v2  ;;  %v1110_v3 = vld [vmem:[%s1315_s1 + $0x14] ss:$8 sps:$4 sm:$0xff]  }
   0x2   :  { %82 = vmatprep.subr.bf16.mxu0 %v1097_v0  ;;  %24 = vst.msk [vmem:[#allocation2] sm:$0x3] %vm23_vm0, %v1064_v4  ;;  %25 = vst.msk [vmem:[#allocation3] sm:$0x3] %vm23_vm0, %v1064_v4  ;;  %180 = vmatprep.subr.bf16.mxu1 %v1097_v0  ;;  %v1121_v5 = vld [vmem:[%s1315_s1 + $0x10] ss:$8 sps:$4 sm:$0xff]  }
   0x3   :  { %83 = vmatpush1.bf16.msra.mxu0 %v1102_v1  ;;  %181 = vmatpush1.bf16.msra.mxu1 %v1102_v1  ;;  %v1128_v6 = vld [vmem:[%s1315_s1 + $0x24] ss:$8 sps:$4 sm:$0xff]   ;;  %v1134_v7 = vld [vmem:[%s1315_s1 + $0x20] ss:$8 sps:$4 sm:$0xff]   ;;  %v1142_v8 = vld [vmem:[%s1315_s1 + $0x34] ss:$8 sps:$4 sm:$0xff]  }
   0x4   :  { %84 = vmatprep.subr.bf16.mxu0 %v1110_v3  ;;  %182 = vmatprep.subr.bf16.mxu1 %v1110_v3 }
   0x7   :  { %85 = vmatpush1.bf16.msra.mxu0 %v1121_v5  ;;  %183 = vmatpush1.bf16.msra.mxu1 %v1121_v5 }
   0x8   :  { %86 = vmatprep.subr.bf16.mxu0 %v1128_v6  ;;  %184 = vmatprep.subr.bf16.mxu1 %v1128_v6 }
   0x9   :  { %9 = vsyncpa [#allocation5], 0  ;;  %v908_v9 = vld.sshfl [vmem:[#allocation3] sm:$0x3 pattern:$0x76325410]  ;;  %v129_v15 = vlaneseq }
   0xa   :  { %s1065_s29 = smov 64   ;;  %v1150_v10 = vld [vmem:[%s1315_s1 + $0x30] ss:$8 sps:$4 sm:$0xff]   ;;  %v34_v11 = vld [vmem:[#allocation2] sm:$0x3]  ;;  %vm78_vm1 = vcmask 523264  }
   0xb   :  { %150 = vrot.lane.b32.xlu0 %v908_v9, %s1065_s29  ;;  %87 = vmatpush1.bf16.msra.mxu0 %v1134_v7  ;;  %v37_v12 = vpack.c.bf16 %v34_v11, %v34_v11  ;;  %v1066_v13 = vmov 1983009808   ;;  %v130_v17 = vshrl.u32 %v129_v15, 7  ;;  %v36_v23 = vld [vmem:[%s1314_s0] sm:$0xf]  ;;  %vm1067_vm2 = vmmov 0  }
   0xc   :  { %185 = vmatpush1.bf16.msra.mxu1 %v1134_v7  ;;  %88 = vmatprep.subr.bf16.mxu0 %v1142_v8  ;;  %v127_v14 = vunpack.c.l.s4 %v1066_v13  ;;  %v909_v48 = vld [vmem:[%s1314_s0 + $0x4] sm:$0xf]  ;;  %s1068_s30 = smov [#allocation4]  }
   0xd   :  { %186 = vmatprep.subr.bf16.mxu1 %v1142_v8  ;;  %s890_s5 = sshll.u32 %s1068_s30, 4  ;;  %s891_s5 = int_to_ptr.vmem [resolvable:$true] %s890_s5 }
   0xe   :  { %v128_v16 = vunpack.c.0.s8 %v127_v14  ;;  %p1044_p1 = scmp.lt.s32.totalorder %s891_s5, %s891_s5 }
   0xf   :  { %89 = vmatpush1.bf16.msra.mxu0 %v1150_v10 }
  0x10   :  { %187 = vmatpush1.bf16.msra.mxu1 %v1150_v10  ;;  %267 = vmatprep.subr.bf16.mxu0 %v1097_v0  ;;  %v1169_v19 = vsub.s32 %v128_v16, %v130_v17 }
  0x11   :  { %354 = vmatprep.subr.bf16.mxu1 %v1097_v0 }
  0x12   :  { %906 = vmatmul.mubr.msk.bf16.vlgmr.msra.gmra.mrb[0].mxu0 %vm78_vm1, %v37_v12 }
  0x13   :  { %268 = vmatpush1.bf16.msra.mxu0 %v1102_v1  ;;  %299 = vmatprep.mubr.bf16.mxu0 %v1063_v2 }
  0x14   :  { %269 = vmatprep.subr.bf16.mxu0 %v1110_v3 }
  0x17   :  { %270 = vmatpush1.bf16.msra.mxu0 %v1121_v5 }
  0x18   :  { %271 = vmatprep.subr.bf16.mxu0 %v1128_v6 }
  0x1b   :  { %272 = vmatpush1.bf16.msra.mxu0 %v1134_v7 }
  0x1c   :  { %273 = vmatprep.subr.bf16.mxu0 %v1142_v8 }
  0x1f   :  { %274 = vmatpush1.bf16.msra.mxu0 %v1150_v10 }
  0x20   :  { %441 = vmatprep.subr.bf16.mxu0 %v1097_v0 }
  0x7d   :  { %v151_v34 = vpop.permute.xlu0 %150 }
  0xe5   :  { %v116_v18 = vpop.f32.mrb[0].mxu0 }
  0xe6   :  { %v118_v20 = vpop.f32.mrb[1].mxu0 }
  0xe7   :  { %v125_v21 = vcombine.low %v116_v18, %v118_v20  ;;  %v120_v22 = vpop.f32.mrb[2].mxu0  ;;  %v912_v18 = vld [vmem:[%s1314_s0 + $0x8] sm:$0xf] }
  0xe8   :  { %v121_v24 = vpop.f32.mrb[3].mxu0 }
  0xe9   :  { %v132_v25 = vrot.slane %v125_v21, %v1169_v19 }
  0xeb   :  { %v134_v26 = vadd.f32 %v132_v25, %v36_v23 }
  0xed   :  { %v907_v27 = vmul.f32 -1.442695, %v134_v26 }
  0xef   :  { %975 = vpow2.f32 %v907_v27 }
  0xf0   :  { %977 = vtanh.f32 %v134_v26 }
  0xf9   :  { %v976_v28 = vpop.eup %975 }
  0xfa   :  { %v138_v29 = vadd.f32 1.0, %v976_v28  ;;  %v978_v30 = vpop.eup %977 }
  0xfb   :  { %v155_v31 = vrot.slane %v978_v30, 2 }
  0xfc   :  { %979 = vrcp.f32 %v138_v29 }
 0x106   :  { %v980_v32 = vpop.eup %979 }
 0x107   :  { %165 = vrot.lane.b32.xlu1 %v980_v32, %s1065_s29  ;;  %v157_v33 = vmul.f32 %v980_v32, %v155_v31  ;;  %v153_v35 = vmul.f32 %v980_v32, %v151_v34 }
 0x109   :  { %159 = vrot.lane.b32.xlu0 %v157_v33, %s1065_s29 }
 0x179   :  { %v166_v39 = vpop.permute.xlu1 %165 }
 0x17a   :  { %v167_v40 = vrot.slane %v166_v39, 2 }
 0x17b   :  { %v160_v36 = vpop.permute.xlu0 %159 }
 0x17c   :  { %v162_v37 = vadd.f32 %v160_v36, %v153_v35 }
 0x17e   :  { %981 = vtanh.f32 %v162_v37 }
 0x188   :  { %v982_v38 = vpop.eup %981 }
 0x189   :  { %170 = vrot.lane.b32.xlu1 %v982_v38, %s1065_s29 }
 0x1fb   :  { %v171_v41 = vpop.permute.xlu1 %170 }
 0x1fc   :  { %v173_v42 = vmul.f32 %v171_v41, %v167_v40 }
 0x1fe   :  { %v176_v43 = vpack.c.bf16 %v173_v42, %v173_v42 }
 0x200   :  { %910 = vmatmul.mubr.msk.bf16.vlgmr.msra.gmra.mrb[0].mxu1 %vm78_vm1, %v176_v43  ;;  %v915_v43 = vld [vmem:[%s1314_s0 + $0xc] sm:$0xf] }
 0x201   :  { %355 = vmatpush1.bf16.msra.mxu1 %v1102_v1  ;;  %386 = vmatprep.mubr.bf16.mxu1 %v1063_v2 }
 0x202   :  { %356 = vmatprep.subr.bf16.mxu1 %v1110_v3 }
 0x205   :  { %357 = vmatpush1.bf16.msra.mxu1 %v1121_v5 }
 0x206   :  { %358 = vmatprep.subr.bf16.mxu1 %v1128_v6 }
 0x209   :  { %359 = vmatpush1.bf16.msra.mxu1 %v1134_v7 }
 0x20a   :  { %360 = vmatprep.subr.bf16.mxu1 %v1142_v8 }
 0x20d   :  { %361 = vmatpush1.bf16.msra.mxu1 %v1150_v10 }
 0x20e   :  { %528 = vmatprep.subr.bf16.mxu1 %v1097_v0 }
 0x2d3   :  { %v214_v44 = vpop.f32.mrb[0].mxu1 }
 0x2d4   :  { %v216_v45 = vpop.f32.mrb[1].mxu1 }
 0x2d5   :  { %v223_v46 = vcombine.low %v214_v44, %v216_v45  ;;  %v218_v47 = vpop.f32.mrb[2].mxu1 }
 0x2d6   :  { %v219_v49 = vpop.f32.mrb[3].mxu1 }
 0x2d7   :  { %v230_v50 = vrot.slane %v223_v46, %v1169_v19 }
 0x2d9   :  { %v232_v51 = vadd.f32 %v909_v48, %v230_v50 }
 0x2db   :  { %v911_v52 = vmul.f32 -1.442695, %v232_v51 }
 0x2dd   :  { %983 = vpow2.f32 %v911_v52 }
 0x2de   :  { %985 = vtanh.f32 %v232_v51 }
 0x2e7   :  { %v984_v53 = vpop.eup %983 }
 0x2e8   :  { %v236_v54 = vadd.f32 1.0, %v984_v53  ;;  %v986_v55 = vpop.eup %985 }
 0x2e9   :  { %v242_v56 = vrot.slane %v986_v55, 2 }
 0x2ea   :  { %987 = vrcp.f32 %v236_v54 }
 0x2f4   :  { %v988_v57 = vpop.eup %987 }
 0x2f5   :  { %252 = vrot.lane.b32.xlu1 %v988_v57, %s1065_s29  ;;  %v244_v58 = vmul.f32 %v988_v57, %v242_v56  ;;  %v240_v59 = vmul.f32 %v988_v57, %v162_v37 }
 0x2f7   :  { %246 = vrot.lane.b32.xlu0 %v244_v58, %s1065_s29 }
 0x367   :  { %v253_v63 = vpop.permute.xlu1 %252 }
 0x368   :  { %v254_v9 = vrot.slane %v253_v63, 2 }
 0x369   :  { %v247_v60 = vpop.permute.xlu0 %246 }
 0x36a   :  { %v249_v61 = vadd.f32 %v247_v60, %v240_v59 }
 0x36c   :  { %989 = vtanh.f32 %v249_v61 }
 0x376   :  { %v990_v62 = vpop.eup %989 }
 0x377   :  { %257 = vrot.lane.b32.xlu0 %v990_v62, %s1065_s29 }
 0x3e9   :  { %v258_v11 = vpop.permute.xlu0 %257 }
 0x3ea   :  { %v260_v12 = vmul.f32 %v258_v11, %v254_v9 }
 0x3ec   :  { %v263_v13 = vpack.c.bf16 %v260_v12, %v260_v12  ;;  %v918_v12 = vld [vmem:[%s1314_s0 + $0x10] sm:$0xf] }
 0x3ee   :  { %913 = vmatmul.mubr.msk.bf16.vlgmr.msra.gmra.mrb[4].mxu0 %vm78_vm1, %v263_v13 }
 0x3ef   :  { %442 = vmatpush1.bf16.msra.mxu0 %v1102_v1  ;;  %473 = vmatprep.mubr.bf16.mxu0 %v1063_v2 }
 0x3f0   :  { %443 = vmatprep.subr.bf16.mxu0 %v1110_v3 }
 0x3f3   :  { %444 = vmatpush1.bf16.msra.mxu0 %v1121_v5 }
 0x3f4   :  { %445 = vmatprep.subr.bf16.mxu0 %v1128_v6 }
 0x3f7   :  { %446 = vmatpush1.bf16.msra.mxu0 %v1134_v7 }
 0x3f8   :  { %447 = vmatprep.subr.bf16.mxu0 %v1142_v8 }
 0x3fb   :  { %448 = vmatpush1.bf16.msra.mxu0 %v1150_v10 }
 0x3fc   :  { %615 = vmatprep.subr.bf16.mxu0 %v1097_v0 }
 0x4c1   :  { %v301_v14 = vpop.f32.mrb[4].mxu0 }
 0x4c2   :  { %v303_v15 = vpop.f32.mrb[5].mxu0 }
 0x4c3   :  { %v310_v16 = vcombine.low %v301_v14, %v303_v15  ;;  %v305_v17 = vpop.f32.mrb[6].mxu0 }
 0x4c4   :  { %v306_v20 = vpop.f32.mrb[7].mxu0 }
 0x4c5   :  { %v317_v21 = vrot.slane %v310_v16, %v1169_v19 }
 0x4c7   :  { %v319_v22 = vadd.f32 %v912_v18, %v317_v21 }
 0x4c9   :  { %v914_v23 = vmul.f32 -1.442695, %v319_v22 }
 0x4cb   :  { %991 = vpow2.f32 %v914_v23 }
 0x4cc   :  { %993 = vtanh.f32 %v319_v22 }
 0x4d5   :  { %v992_v24 = vpop.eup %991 }
 0x4d6   :  { %v323_v25 = vadd.f32 1.0, %v992_v24  ;;  %v994_v26 = vpop.eup %993 }
 0x4d7   :  { %v329_v27 = vrot.slane %v994_v26, 2 }
 0x4d8   :  { %995 = vrcp.f32 %v323_v25 }
 0x4e2   :  { %v996_v28 = vpop.eup %995 }
 0x4e3   :  { %339 = vrot.lane.b32.xlu0 %v996_v28, %s1065_s29  ;;  %v331_v29 = vmul.f32 %v996_v28, %v329_v27  ;;  %v327_v30 = vmul.f32 %v996_v28, %v249_v61 }
 0x4e5   :  { %333 = vrot.lane.b32.xlu1 %v331_v29, %s1065_s29 }
 0x555   :  { %v340_v34 = vpop.permute.xlu0 %339 }
 0x556   :  { %v341_v35 = vrot.slane %v340_v34, 2 }
 0x557   :  { %v334_v31 = vpop.permute.xlu1 %333 }
 0x558   :  { %v336_v32 = vadd.f32 %v334_v31, %v327_v30 }
 0x55a   :  { %997 = vtanh.f32 %v336_v32 }
 0x564   :  { %v998_v33 = vpop.eup %997 }
 0x565   :  { %344 = vrot.lane.b32.xlu1 %v998_v33, %s1065_s29 }
 0x5d7   :  { %v345_v36 = vpop.permute.xlu1 %344 }
 0x5d8   :  { %v347_v37 = vmul.f32 %v345_v36, %v341_v35 }
 0x5da   :  { %v350_v38 = vpack.c.bf16 %v347_v37, %v347_v37 }
 0x5dc   :  { %916 = vmatmul.mubr.msk.bf16.vlgmr.msra.gmra.mrb[4].mxu1 %vm78_vm1, %v350_v38 }
 0x5dd   :  { %529 = vmatpush1.bf16.msra.mxu1 %v1102_v1  ;;  %560 = vmatprep.mubr.bf16.mxu1 %v1063_v2 }
 0x5de   :  { %530 = vmatprep.subr.bf16.mxu1 %v1110_v3 }
 0x5e1   :  { %531 = vmatpush1.bf16.msra.mxu1 %v1121_v5 }
 0x5e2   :  { %532 = vmatprep.subr.bf16.mxu1 %v1128_v6 }
 0x5e5   :  { %533 = vmatpush1.bf16.msra.mxu1 %v1134_v7 }
 0x5e6   :  { %534 = vmatprep.subr.bf16.mxu1 %v1142_v8 }
 0x5e9   :  { %535 = vmatpush1.bf16.msra.mxu1 %v1150_v10 }
 0x5ea   :  { %702 = vmatprep.subr.bf16.mxu1 %v1097_v0 }
 0x6af   :  { %v388_v39 = vpop.f32.mrb[4].mxu1 }
 0x6b0   :  { %v390_v40 = vpop.f32.mrb[5].mxu1 }
 0x6b1   :  { %v397_v41 = vcombine.low %v388_v39, %v390_v40  ;;  %v392_v42 = vpop.f32.mrb[6].mxu1 }
 0x6b2   :  { %v393_v44 = vpop.f32.mrb[7].mxu1 }
 0x6b3   :  { %v404_v45 = vrot.slane %v397_v41, %v1169_v19 }
 0x6b5   :  { %v406_v46 = vadd.f32 %v915_v43, %v404_v45 }
 0x6b7   :  { %v917_v47 = vmul.f32 -1.442695, %v406_v46 }
 0x6b9   :  { %999 = vpow2.f32 %v917_v47 }
 0x6ba   :  { %1001 = vtanh.f32 %v406_v46 }
 0x6c3   :  { %v1000_v48 = vpop.eup %999 }
 0x6c4   :  { %v410_v49 = vadd.f32 1.0, %v1000_v48  ;;  %v1002_v50 = vpop.eup %1001 }
 0x6c5   :  { %v416_v0 = vrot.slane %v1002_v50, 2 }
 0x6c6   :  { %1003 = vrcp.f32 %v410_v49 }
 0x6d0   :  { %v1004_v51 = vpop.eup %1003 }
 0x6d1   :  { %426 = vrot.lane.b32.xlu1 %v1004_v51, %s1065_s29  ;;  %v418_v52 = vmul.f32 %v1004_v51, %v416_v0  ;;  %v414_v53 = vmul.f32 %v1004_v51, %v336_v32 }
 0x6d3   :  { %420 = vrot.lane.b32.xlu0 %v418_v52, %s1065_s29  ;;  %v924_v52 = vld [vmem:[%s1314_s0 + $0x18] sm:$0xf] }
 0x743   :  { %v427_v57 = vpop.permute.xlu1 %426 }
 0x744   :  { %v428_v58 = vrot.slane %v427_v57, 2 }
 0x745   :  { %v421_v54 = vpop.permute.xlu0 %420 }
 0x746   :  { %v423_v55 = vadd.f32 %v421_v54, %v414_v53 }
 0x748   :  { %1005 = vtanh.f32 %v423_v55 }
 0x752   :  { %v1006_v56 = vpop.eup %1005 }
 0x753   :  { %431 = vrot.lane.b32.xlu0 %v1006_v56, %s1065_s29 }
 0x7c5   :  { %v432_v59 = vpop.permute.xlu0 %431 }
 0x7c6   :  { %v434_v60 = vmul.f32 %v432_v59, %v428_v58 }
 0x7c8   :  { %v437_v61 = vpack.c.bf16 %v434_v60, %v434_v60 }
 0x7ca   :  { %919 = vmatmul.mubr.msk.bf16.vlgmr.msra.gmra.mrb[8].mxu0 %vm78_vm1, %v437_v61 }
 0x7cb   :  { %616 = vmatpush1.bf16.msra.mxu0 %v1102_v1  ;;  %647 = vmatprep.mubr.bf16.mxu0 %v1063_v2 }
 0x7cc   :  { %617 = vmatprep.subr.bf16.mxu0 %v1110_v3 }
 0x7cf   :  { %618 = vmatpush1.bf16.msra.mxu0 %v1121_v5 }
 0x7d0   :  { %619 = vmatprep.subr.bf16.mxu0 %v1128_v6 }
 0x7d3   :  { %620 = vmatpush1.bf16.msra.mxu0 %v1134_v7 }
 0x7d4   :  { %621 = vmatprep.subr.bf16.mxu0 %v1142_v8 }
 0x7d7   :  { %622 = vmatpush1.bf16.msra.mxu0 %v1150_v10 }
 0x7d8   :  { %941 = vmatprep.subr.bf16.mxu0 %v1064_v4 }
 0x89d   :  { %v475_v62 = vpop.f32.mrb[8].mxu0 }
 0x89e   :  { %v477_v63 = vpop.f32.mrb[9].mxu0 }
 0x89f   :  { %v484_v9 = vcombine.low %v475_v62, %v477_v63  ;;  %v479_v11 = vpop.f32.mrb[10].mxu0 }
 0x8a0   :  { %v480_v13 = vpop.f32.mrb[11].mxu0 }
 0x8a1   :  { %v491_v14 = vrot.slane %v484_v9, %v1169_v19 }
 0x8a3   :  { %v493_v15 = vadd.f32 %v918_v12, %v491_v14 }
 0x8a5   :  { %v920_v16 = vmul.f32 -1.442695, %v493_v15 }
 0x8a7   :  { %1007 = vpow2.f32 %v920_v16 }
 0x8a8   :  { %1009 = vtanh.f32 %v493_v15 }
 0x8b1   :  { %v1008_v17 = vpop.eup %1007 }
 0x8b2   :  { %v497_v18 = vadd.f32 1.0, %v1008_v17  ;;  %v1010_v20 = vpop.eup %1009 }
 0x8b3   :  { %v503_v21 = vrot.slane %v1010_v20, 2 }
 0x8b4   :  { %1011 = vrcp.f32 %v497_v18 }
 0x8be   :  { %v1012_v22 = vpop.eup %1011 }
 0x8bf   :  { %513 = vrot.lane.b32.xlu0 %v1012_v22, %s1065_s29  ;;  %v505_v23 = vmul.f32 %v1012_v22, %v503_v21  ;;  %v501_v24 = vmul.f32 %v1012_v22, %v423_v55 }
 0x8c1   :  { %507 = vrot.lane.b32.xlu1 %v505_v23, %s1065_s29  ;;  %v927_v23 = vld [vmem:[%s1314_s0 + $0x1c] sm:$0xf] }
 0x931   :  { %v514_v28 = vpop.permute.xlu0 %513 }
 0x932   :  { %v515_v29 = vrot.slane %v514_v28, 2 }
 0x933   :  { %v508_v25 = vpop.permute.xlu1 %507 }
 0x934   :  { %v510_v26 = vadd.f32 %v508_v25, %v501_v24 }
 0x936   :  { %1013 = vtanh.f32 %v510_v26 }
 0x940   :  { %v1014_v27 = vpop.eup %1013 }
 0x941   :  { %518 = vrot.lane.b32.xlu1 %v1014_v27, %s1065_s29 }
 0x9b3   :  { %v519_v30 = vpop.permute.xlu1 %518 }
 0x9b4   :  { %v521_v31 = vmul.f32 %v519_v30, %v515_v29 }
 0x9b6   :  { %v524_v32 = vpack.c.bf16 %v521_v31, %v521_v31 }
 0x9b8   :  { %922 = vmatmul.mubr.msk.bf16.vlgmr.msra.gmra.mrb[8].mxu1 %vm78_vm1, %v524_v32 }
 0x9b9   :  { %703 = vmatpush1.bf16.msra.mxu1 %v1102_v1  ;;  %734 = vmatprep.mubr.bf16.mxu1 %v1063_v2  ;;  %v921_v1 = vld [vmem:[%s1314_s0 + $0x14] sm:$0xf] }
 0x9ba   :  { %704 = vmatprep.subr.bf16.mxu1 %v1110_v3 }
 0x9bd   :  { %705 = vmatpush1.bf16.msra.mxu1 %v1121_v5 }
 0x9be   :  { %706 = vmatprep.subr.bf16.mxu1 %v1128_v6 }
 0x9c1   :  { %707 = vmatpush1.bf16.msra.mxu1 %v1134_v7 }
 0x9c2   :  { %708 = vmatprep.subr.bf16.mxu1 %v1142_v8 }
 0x9c5   :  { %709 = vmatpush1.bf16.msra.mxu1 %v1150_v10 }
 0xa8b   :  { %v562_v33 = vpop.f32.mrb[8].mxu1 }
 0xa8c   :  { %v564_v34 = vpop.f32.mrb[9].mxu1 }
 0xa8d   :  { %v571_v35 = vcombine.low %v562_v33, %v564_v34  ;;  %v566_v36 = vpop.f32.mrb[10].mxu1  ;;  %v971_v34 = vld [vmem:[%s1316_s2] sm:$0xff]  }
 0xa8e   :  { %v567_v2 = vpop.f32.mrb[11].mxu1  ;;  %v973_v36 = vld [vmem:[%s1316_s2 + $0x10] sm:$0xff]  }
 0xa8f   :  { %v578_v3 = vrot.slane %v571_v35, %v1169_v19  ;;  %v972_v35 = vld [vmem:[%s1316_s2 + $0x8] sm:$0xff]  }
 0xa91   :  { %v580_v5 = vadd.f32 %v921_v1, %v578_v3  ;;  %v974_v3 = vld [vmem:[%s1316_s2 + $0x18] sm:$0xff]  }
 0xa93   :  { %v923_v37 = vmul.f32 -1.442695, %v580_v5 }
 0xa95   :  { %1015 = vpow2.f32 %v923_v37 }
 0xa96   :  { %1017 = vtanh.f32 %v580_v5 }
 0xa9f   :  { %v1016_v6 = vpop.eup %1015 }
 0xaa0   :  { %v584_v7 = vadd.f32 1.0, %v1016_v6  ;;  %v1018_v8 = vpop.eup %1017 }
 0xaa1   :  { %v590_v10 = vrot.slane %v1018_v8, 2 }
 0xaa2   :  { %1019 = vrcp.f32 %v584_v7 }
 0xaac   :  { %v1020_v38 = vpop.eup %1019 }
 0xaad   :  { %600 = vrot.lane.b32.xlu1 %v1020_v38, %s1065_s29  ;;  %v592_v39 = vmul.f32 %v1020_v38, %v590_v10  ;;  %v588_v40 = vmul.f32 %v1020_v38, %v510_v26 }
 0xaaf   :  { %594 = vrot.lane.b32.xlu0 %v592_v39, %s1065_s29 }
 0xb1f   :  { %v601_v44 = vpop.permute.xlu1 %600 }
 0xb20   :  { %v602_v45 = vrot.slane %v601_v44, 2 }
 0xb21   :  { %v595_v41 = vpop.permute.xlu0 %594 }
 0xb22   :  { %v597_v42 = vadd.f32 %v595_v41, %v588_v40 }
 0xb24   :  { %1021 = vtanh.f32 %v597_v42 }
 0xb2e   :  { %v1022_v43 = vpop.eup %1021 }
 0xb2f   :  { %605 = vrot.lane.b32.xlu0 %v1022_v43, %s1065_s29 }
 0xba1   :  { %v606_v46 = vpop.permute.xlu0 %605 }
 0xba2   :  { %v608_v47 = vmul.f32 %v606_v46, %v602_v45 }
 0xba4   :  { %v611_v48 = vpack.c.bf16 %v608_v47, %v608_v47 }
 0xba6   :  { %925 = vmatmul.mubr.msk.bf16.vlgmr.msra.gmra.mrb[12].mxu0 %vm78_vm1, %v611_v48 }
 0xba7   :  { %942 = vmatpush3.bf16.msra.mxu0 %v971_v34  ;;  %949 = vmatprep.mubr.msk.bf16.mxu0 %vm1067_vm2, %v1064_v4 }
 0xba8   :  { %943 = vmatprep.subr.bf16.mxu0 %v1064_v4 }
 0xbab   :  { %944 = vmatpush3.bf16.msra.mxu0 %v972_v35 }
 0xbac   :  { %945 = vmatprep.subr.bf16.mxu0 %v1064_v4 }
 0xbaf   :  { %946 = vmatpush3.bf16.msra.mxu0 %v973_v36 }
 0xbb0   :  { %947 = vmatprep.subr.bf16.mxu0 %v1064_v4  ;;  %v930_v4 = vld [vmem:[%s1317_s3] ss:$0 sm:$0xff] }
 0xbb3   :  { %948 = vmatpush3.bf16.msra.mxu0 %v974_v3 }
 0xc79   :  { %v649_v49 = vpop.f32.mrb[12].mxu0 }
 0xc7a   :  { %v651_v50 = vpop.f32.mrb[13].mxu0 }
 0xc7b   :  { %v658_v0 = vcombine.low %v649_v49, %v651_v50  ;;  %v653_v51 = vpop.f32.mrb[14].mxu0 }
 0xc7c   :  { %v654_v53 = vpop.f32.mrb[15].mxu0 }
 0xc7d   :  { %v665_v54 = vrot.slane %v658_v0, %v1169_v19 }
 0xc7f   :  { %v667_v55 = vadd.f32 %v924_v52, %v665_v54 }
 0xc81   :  { %v926_v56 = vmul.f32 -1.442695, %v667_v55 }
 0xc83   :  { %1023 = vpow2.f32 %v926_v56 }
 0xc84   :  { %1025 = vtanh.f32 %v667_v55 }
 0xc8d   :  { %v1024_v57 = vpop.eup %1023 }
 0xc8e   :  { %v671_v58 = vadd.f32 1.0, %v1024_v57  ;;  %v1026_v59 = vpop.eup %1025 }
 0xc8f   :  { %v677_v60 = vrot.slane %v1026_v59, 2 }
 0xc90   :  { %1027 = vrcp.f32 %v671_v58 }
 0xc9a   :  { %v1028_v61 = vpop.eup %1027 }
 0xc9b   :  { %687 = vrot.lane.b32.xlu0 %v1028_v61, %s1065_s29  ;;  %v679_v62 = vmul.f32 %v1028_v61, %v677_v60  ;;  %v675_v63 = vmul.f32 %v1028_v61, %v597_v42 }
 0xc9d   :  { %681 = vrot.lane.b32.xlu1 %v679_v62, %s1065_s29 }
 0xd0d   :  { %v688_v13 = vpop.permute.xlu0 %687 }
 0xd0e   :  { %v689_v14 = vrot.slane %v688_v13, 2 }
 0xd0f   :  { %v682_v9 = vpop.permute.xlu1 %681 }
 0xd10   :  { %v684_v11 = vadd.f32 %v682_v9, %v675_v63 }
 0xd12   :  { %1029 = vtanh.f32 %v684_v11 }
 0xd1c   :  { %v1030_v12 = vpop.eup %1029 }
 0xd1d   :  { %692 = vrot.lane.b32.xlu1 %v1030_v12, %s1065_s29 }
 0xd8f   :  { %v693_v15 = vpop.permute.xlu1 %692 }
 0xd90   :  { %v695_v16 = vmul.f32 %v693_v15, %v689_v14 }
 0xd92   :  { %v698_v17 = vpack.c.bf16 %v695_v16, %v695_v16 }
 0xd94   :  { %928 = vmatmul.mubr.msk.bf16.vlgmr.msra.gmra.mrb[12].mxu1 %vm78_vm1, %v698_v17 }
 0xe67   :  { %v736_v18 = vpop.f32.mrb[12].mxu1 }
 0xe68   :  { %v738_v20 = vpop.f32.mrb[13].mxu1 }
 0xe69   :  { %v745_v21 = vcombine.low %v736_v18, %v738_v20  ;;  %v740_v22 = vpop.f32.mrb[14].mxu1 }
 0xe6a   :  { %v741_v24 = vpop.f32.mrb[15].mxu1 }
 0xe6b   :  { %v752_v25 = vrot.slane %v745_v21, %v1169_v19 }
 0xe6d   :  { %v754_v26 = vadd.f32 %v927_v23, %v752_v25 }
 0xe6f   :  { %v929_v27 = vmul.f32 -1.442695, %v754_v26 }
 0xe71   :  { %1031 = vpow2.f32 %v929_v27 }
 0xe72   :  { %1033 = vtanh.f32 %v754_v26 }
 0xe7b   :  { %v1032_v28 = vpop.eup %1031 }
 0xe7c   :  { %v758_v29 = vadd.f32 1.0, %v1032_v28  ;;  %v1034_v30 = vpop.eup %1033 }
 0xe7d   :  { %v764_v31 = vrot.slane %v1034_v30, 2 }
 0xe7e   :  { %1035 = vrcp.f32 %v758_v29 }
 0xe88   :  { %v1036_v32 = vpop.eup %1035 }
 0xe89   :  { %774 = vrot.lane.b32.xlu1 %v1036_v32, %s1065_s29  ;;  %v766_v33 = vmul.f32 %v1036_v32, %v764_v31  ;;  %v762_v1 = vmul.f32 %v1036_v32, %v684_v11 }
 0xe8b   :  { %768 = vrot.lane.b32.xlu0 %v766_v33, %s1065_s29 }
 0xefb   :  { %v775_v7 = vpop.permute.xlu1 %774 }
 0xefc   :  { %v776_v10 = vrot.slane %v775_v7, 2 }
 0xefd   :  { %v769_v2 = vpop.permute.xlu0 %768 }
 0xefe   :  { %v771_v5 = vadd.f32 %v769_v2, %v762_v1 }
 0xf00   :  { %1037 = vtanh.f32 %v771_v5  ;;  %v792_v37 = vrot.slane %v771_v5, %v1169_v19 }
 0xf02   :  { %793 = vrot.lane.b32.xlu1 %v792_v37, %s1065_s29 }
 0xf0a   :  { %v1038_v6 = vpop.eup %1037 }
 0xf0b   :  { %779 = vrot.lane.b32.xlu0 %v1038_v6, %s1065_s29  ;;  %s1039_s29 = scalar_lea.vmem %s891_s5, 32 }
 0xf0c   :  { %p1040_p0 = scmp.ne.s32.totalorder %s891_s5, %s1039_s29  ;;  %p1045_p2 = scmp.lt.s32.totalorder %s1039_s29, %s1039_s29 }
 0xf0e   :  { %p1046_p3 = por %p1045_p2, %p1044_p1 }
 0xf10   :  { %p1047_p4 = pnand %p1046_p3, %p1040_p0 }
 0xf74   :  { %v794_v8 = vpop.permute.xlu1 %793 }
 0xf75   :  { %796 = vst.msk [vmem:[#allocation3] sm:$0x3] %vm23_vm0, %v794_v8 }
 0xf7d   :  { %v780_v38 = vpop.permute.xlu0 %779 }
 0xf7e   :  { %v782_v39 = vmul.f32 %v780_v38, %v776_v10 }
 0xf80   :  { %784 = vst.msk [vmem:[#allocation2] sm:$0x3] %vm23_vm0, %v782_v39  ;;  %v800_v40 = vpack.c.bf16 %v782_v39, %v782_v39 }
 0xf82   :  { %950 = vmatmul.mubr.msk.bf16.vlgmr.msra.gmra.mrb[16].mxu0 %vm78_vm1, %v800_v40 }
0x1055   :  { %v877_v19 = vpop.f32.mrb[16].mxu0 }
0x1056   :  { %v878_v41 = vadd.f32 %v930_v4, %v877_v19  ;;  %v951_v42 = vpop.f32.mrb[17].mxu0 }
0x1057   :  { %v880_v43 = vpop.f32.mrb[18].mxu0 }
0x1058   :  { %883 = vst [vmem:[#allocation4] sm:$0x3] %v878_v41  ;;  %v952_v44 = vpop.f32.mrb[19].mxu0 }
0x1059   :  { %1050 = shalt.err (!%p1047_p4)
}
0x105a   :  { %s1051_s3 = scalar_lea.hbm %s1318_s4, 32 }
0x105b   :  { %p1052_p5 = scmp.ne.s32.totalorder %s1318_s4, %s1051_s3  ;;  %p1055_p6 = scmp.lt.u32.totalorder %s1051_s3, %s1318_s4 }
0x105d   :  { %p1057_p7 = pnand %p1055_p6, %p1052_p5 }
0x105f   :  { %1060 = shalt.err (!%p1057_p7)
}
0x1060   :  { %893 = dma.vmem_to_hbm [thread:$0]  %s891_s5, 32, %s1318_s4, [#allocation5]  }
0x1061   :  { %1061 = dma.done.wait [#allocation5], 32  }
0x1062   :  { %1062 = vsyncadd [#allocation5], 4294967264 }
0x1063   :  { %897 = vsyncpa [#allocation5], 1 }

</bundles_post_ra>
